<compile_context>
chip_gen: v6e
topology: v6e:2x2x1
jax: 0.10.0
libtpu: 0.0.40
codegen_flags: <defaults>
</compile_context>

<pallas_src>
import functools

import jax
import jax.numpy as jnp
from jax.experimental import pallas as pl
from jax.experimental.pallas import tpu as pltpu


def _round_up(x, m):
    return ((x + m - 1) // m) * m


def _mlp_packed_kernel(x_ref, s_ref, w1_ref, b1_ref, w2_ref, b2_ref, o_ref, *, eps):
    """One row-tile of the lane-packed LayerNorm -> fc1 -> ReLU -> fc2 pipeline.

    x_ref : (tile, P*in)   P original rows packed side-by-side on the lanes.
    s_ref : (P*in, P*in)   block-diagonal segment-averaging matrix, f32.
    w1_ref: (P*in, P*hid)  block-diag fc1 weight with LayerNorm affine folded in (bf16).
    b1_ref: (1, P*hid)     tiled folded fc1 bias (f32).
    w2_ref: (P*hid, P*hid) block-diag fc2 weight (bf16).
    b2_ref: (1, P*hid)     tiled fc2 bias (f32).
    """
    x = x_ref[...].astype(jnp.float32)
    s = s_ref[...]

    # Per-32-lane-segment LayerNorm statistics via block-averaging matmuls: keeps the
    # stats in f32, avoids cross-lane XLU reductions, and the MXU has plenty of slack.
    mean = jnp.dot(x, s, preferred_element_type=jnp.float32)
    xc = x - mean
    var = jnp.dot(xc * xc, s, preferred_element_type=jnp.float32)
    xn = xc * jax.lax.rsqrt(var + eps)

    # fc1 (LayerNorm affine folded in) -> ReLU.  dropout1 is identity at inference.
    h = jnp.dot(xn.astype(w1_ref.dtype), w1_ref[...],
                preferred_element_type=jnp.float32) + b1_ref[...]
    h = jnp.maximum(h, 0.0)

    # fc2.  dropout2 is identity at inference.
    y = jnp.dot(h.astype(w2_ref.dtype), w2_ref[...],
                preferred_element_type=jnp.float32) + b2_ref[...]

    o_ref[...] = y.astype(o_ref.dtype)
    # TODO(synk): training-mode dropout (stochastic masking) is not implemented; the
    # forward matches PyTorch eval() semantics.


def fold_params(params, pack, compute_dtype=jnp.bfloat16):
    """Fold the LayerNorm affine into fc1 and build lane-packed block-diagonal operands."""
    ln_w, ln_b, w1, b1, w2, b2 = params
    ln_w = jnp.asarray(ln_w, jnp.float32).reshape(-1)
    ln_b = jnp.asarray(ln_b, jnp.float32).reshape(1, -1)
    w1 = jnp.asarray(w1, jnp.float32)              # (in, hid)
    b1 = jnp.asarray(b1, jnp.float32).reshape(1, -1)
    w2 = jnp.asarray(w2, jnp.float32)              # (hid, hid)
    b2 = jnp.asarray(b2, jnp.float32).reshape(1, -1)
    in_dim = w1.shape[0]

    w1_f = w1 * ln_w[:, None]                      # diag(ln_w) @ W1
    b1_f = ln_b @ w1 + b1                          # ln_b @ W1 + b1

    eye = jnp.eye(pack, dtype=jnp.float32)
    seg_avg = jnp.full((in_dim, in_dim), 1.0 / in_dim, jnp.float32)
    s_blk = jnp.kron(eye, seg_avg)                              # (P*in, P*in)
    w1_blk = jnp.kron(eye, w1_f).astype(compute_dtype)          # (P*in, P*hid)
    w2_blk = jnp.kron(eye, w2).astype(compute_dtype)            # (P*hid, P*hid)
    b1_blk = jnp.tile(b1_f, (1, pack))                          # (1, P*hid)
    b2_blk = jnp.tile(b2, (1, pack))                            # (1, P*hid)
    return s_blk, w1_blk, b1_blk, w2_blk, b2_blk


def additional_features_fc(verts_f, params, *, tile_rows=8192, eps=1e-6,
                           compute_dtype=jnp.bfloat16, out_dtype=None):
    """verts_f: (..., f_dim_in). Returns (..., f_dim_out). Forward of the PyTorch module."""
    w1 = jnp.asarray(params[2])
    in_dim, hid_dim = w1.shape
    out_dtype = verts_f.dtype if out_dtype is None else out_dtype

    # Lane packing factor: put P original in_dim-wide rows side by side on the 128 lanes.
    pack = 128 // in_dim if (in_dim <= 128 and 128 % in_dim == 0) else 1
    in_w = pack * in_dim
    out_w = pack * hid_dim

    s_blk, w1_blk, b1_blk, w2_blk, b2_blk = fold_params(params, pack, compute_dtype)

    orig_shape = verts_f.shape
    x2d = verts_f.reshape(-1, in_dim)
    rows = x2d.shape[0]

    # Pad only to a multiple of the pack factor (<= pack-1 rows, usually none); blocks
    # overhanging the packed array are handled by Pallas' ragged-edge masking.
    rows_p = _round_up(rows, pack)
    if rows_p != rows:
        x2d = jnp.pad(x2d, ((0, rows_p - rows), (0, 0)))
    packed_rows = rows_p // pack
    x_packed = x2d.reshape(packed_rows, in_w)      # contiguous rows -> bitwise-free reshape

    # Row tile (in packed rows): as large as requested, but keep >= 2 grid steps whenever
    # possible so v7x megacore can shard rows across its two TensorCores.
    target = max(8, _round_up(max(tile_rows // pack, 1), 8))
    tile_p = min(target, _round_up(packed_rows, 8))
    if packed_rows > 8 and tile_p >= packed_rows:
        tile_p = max(8, _round_up(pl.cdiv(packed_rows, 2), 8))
    if packed_rows < 8:
        tile_p = packed_rows                       # block == full sublane extent
    grid = (pl.cdiv(packed_rows, tile_p),)

    # VMEM budget from the actual footprint (double-buffered x/out tiles + constants),
    # capped at 48 MiB to leave compiler headroom on the 64 MiB v7x part.
    in_itemsize = jnp.dtype(verts_f.dtype).itemsize
    out_itemsize = jnp.dtype(out_dtype).itemsize
    const_bytes = (s_blk.size * 4
                   + (w1_blk.size + w2_blk.size) * jnp.dtype(compute_dtype).itemsize
                   + (b1_blk.size + b2_blk.size) * 4)
    tile_bytes = tile_p * (in_w * in_itemsize + out_w * out_itemsize)
    vmem_limit = int(min(max(4 * tile_bytes + 4 * const_bytes + (8 << 20), 32 << 20),
                         48 << 20))

    cost = pl.CostEstimate(
        flops=int(2 * rows_p * in_dim * (2 * in_dim + hid_dim)
                  + 2 * rows_p * hid_dim * hid_dim + 6 * rows_p * in_dim),
        transcendentals=int(rows_p * in_dim),
        bytes_accessed=int(rows_p * (in_dim * in_itemsize + hid_dim * out_itemsize)
                           + const_bytes),
    )

    const_map = lambda i: (0, 0)

    out_packed = pl.pallas_call(
        functools.partial(_mlp_packed_kernel, eps=eps),
        out_shape=jax.ShapeDtypeStruct((packed_rows, out_w), out_dtype),
        grid_spec=pltpu.PrefetchScalarGridSpec(
            num_scalar_prefetch=0,
            grid=grid,
            in_specs=[
                pl.BlockSpec((tile_p, in_w), lambda i: (i, 0)),   # x tile (lane-dense)
                pl.BlockSpec((in_w, in_w), const_map),            # segment-averaging S
                pl.BlockSpec((in_w, out_w), const_map),           # fc1 W (folded, block-diag)
                pl.BlockSpec((1, out_w), const_map),              # fc1 b (folded, tiled)
                pl.BlockSpec((out_w, out_w), const_map),          # fc2 W (block-diag)
                pl.BlockSpec((1, out_w), const_map),              # fc2 b (tiled)
            ],
            out_specs=pl.BlockSpec((tile_p, out_w), lambda i: (i, 0)),
        ),
        compiler_params=pltpu.CompilerParams(
            dimension_semantics=("parallel",),
            vmem_limit_bytes=vmem_limit),
        cost_estimate=cost,
    )(x_packed, s_blk, w1_blk, b1_blk, w2_blk, b2_blk)

    out = out_packed.reshape(rows_p, hid_dim)[:rows]
    return out.reshape(*orig_shape[:-1], hid_dim)


def init_params(key, f_dim_in, f_dim_out):
    """Deterministic init matching the PyTorch module:
       LayerNorm: weight=1, bias=0; Linear: xavier_uniform weight, bias=0."""
    k1, k2 = jax.random.split(key, 2)

    def xavier_uniform(k, fan_in, fan_out):
        bound = (6.0 / (fan_in + fan_out)) ** 0.5
        # stored as (in, out) so the kernel does x @ W directly
        return jax.random.uniform(k, (fan_in, fan_out), jnp.float32, -bound, bound)

    ln_w = jnp.ones((f_dim_in,), jnp.float32)
    ln_b = jnp.zeros((f_dim_in,), jnp.float32)
    w1 = xavier_uniform(k1, f_dim_in, f_dim_out)
    b1 = jnp.zeros((f_dim_out,), jnp.float32)
    w2 = xavier_uniform(k2, f_dim_out, f_dim_out)
    b2 = jnp.zeros((f_dim_out,), jnp.float32)
    return (ln_w, ln_b, w1, b1, w2, b2)


def _reference(verts_f, params, eps=1e-6):
    ln_w, ln_b, w1, b1, w2, b2 = params
    x = verts_f.astype(jnp.float32)
    mean = jnp.mean(x, axis=-1, keepdims=True)
    var = jnp.mean((x - mean) ** 2, axis=-1, keepdims=True)
    xn = (x - mean) * jax.lax.rsqrt(var + eps) * ln_w.reshape(-1) + ln_b.reshape(-1)
    h = jnp.maximum(xn @ w1 + b1.reshape(-1), 0.0)
    return h @ w2 + b2.reshape(-1)


if __name__ == "__main__":
    key = jax.random.PRNGKey(0)
    kp, kx = jax.random.split(key)

    B, N, f_dim_in, f_dim_out = 2, 64, 32, 32   # 128 vertex rows total
    params = init_params(kp, f_dim_in, f_dim_out)
    verts_f = jax.random.normal(kx, (B, N, f_dim_in), jnp.float32)

    out = jax.block_until_ready(additional_features_fc(verts_f, params))
    ref = _reference(verts_f, params)
    assert out.shape == (B, N, f_dim_out), out.shape
    # bf16 matmuls => loosened tolerance vs f32 reference.
    assert jnp.allclose(out, ref, atol=5e-2, rtol=5e-2), float(jnp.max(jnp.abs(out - ref)))

    # Row count that is neither a pack multiple nor a tile multiple exercises both the
    # minimal pack-padding and the ragged last grid block.
    verts_f2 = jax.random.normal(kx, (1, 50, f_dim_in), jnp.float32)
    out2 = jax.block_until_ready(additional_features_fc(verts_f2, params))
    ref2 = _reference(verts_f2, params)
    assert out2.shape == (1, 50, f_dim_out), out2.shape
    assert jnp.allclose(out2, ref2, atol=5e-2, rtol=5e-2), float(jnp.max(jnp.abs(out2 - ref2)))

    # Non-trivial LayerNorm affine exercises the fold-into-fc1 path.
    k1, k2 = jax.random.split(kx)
    ln_w = 1.0 + 0.1 * jax.random.normal(k1, (f_dim_in,), jnp.float32)
    ln_b = 0.1 * jax.random.normal(k2, (f_dim_in,), jnp.float32)
    params3 = (ln_w, ln_b) + params[2:]
    out3 = jax.block_until_ready(additional_features_fc(verts_f, params3))
    ref3 = _reference(verts_f, params3)
    assert jnp.allclose(out3, ref3, atol=5e-2, rtol=5e-2), float(jnp.max(jnp.abs(out3 - ref3)))

    print("KERNEL_OK")
</pallas_src>

<mosaic_0001>
module attributes {stable_mosaic.version = 11 : i64} {
  func.func @_mlp_packed_kernel(%arg0: i32, %arg1: memref<16x128xf32, #tpu.memory_space<vmem>>, %arg2: memref<128x128xf32, #tpu.memory_space<vmem>>, %arg3: memref<128x128xbf16, #tpu.memory_space<vmem>>, %arg4: memref<1x128xf32, #tpu.memory_space<vmem>>, %arg5: memref<128x128xbf16, #tpu.memory_space<vmem>>, %arg6: memref<1x128xf32, #tpu.memory_space<vmem>>, %arg7: memref<16x128xf32, #tpu.memory_space<vmem>>) attributes {dimension_semantics = [#tpu.dimension_semantics<parallel>], iteration_bounds = array<i64: 2>, scalar_prefetch = 0 : i64, scratch_operands = 0 : i64, tpu.core_type = #tpu.core_type<tc>, window_params = [{transform_indices = @transform_0, window_bounds = array<i64: 16, 128>}, {pipeline_mode = #tpu.pipeline_mode<synchronous>, transform_indices = @transform_1, window_bounds = array<i64: 128, 128>}, {pipeline_mode = #tpu.pipeline_mode<synchronous>, transform_indices = @transform_2, window_bounds = array<i64: 128, 128>}, {pipeline_mode = #tpu.pipeline_mode<synchronous>, transform_indices = @transform_3, window_bounds = array<i64: 1, 128>}, {pipeline_mode = #tpu.pipeline_mode<synchronous>, transform_indices = @transform_4, window_bounds = array<i64: 128, 128>}, {pipeline_mode = #tpu.pipeline_mode<synchronous>, transform_indices = @transform_5, window_bounds = array<i64: 1, 128>}, {transform_indices = @transform_6, window_bounds = array<i64: 16, 128>}]} {
    %c0 = arith.constant 0 : index
    %c0_0 = arith.constant 0 : index
    %0 = vector.load %arg1[%c0, %c0_0] : memref<16x128xf32, #tpu.memory_space<vmem>>, vector<16x128xf32>
    %c0_1 = arith.constant 0 : index
    %c0_2 = arith.constant 0 : index
    %1 = vector.load %arg2[%c0_1, %c0_2] : memref<128x128xf32, #tpu.memory_space<vmem>>, vector<128x128xf32>
    %cst = arith.constant dense<0.000000e+00> : vector<16x128xf32>
    %2 = tpu.matmul %0, %1, %cst {dimension_numbers = #tpu.dot_dimension_numbers<[1], [0], [0], [1], [0, 0, 1, 1], [], []>} : vector<16x128xf32>, vector<128x128xf32>, vector<16x128xf32> -> vector<16x128xf32>
    %3 = arith.subf %0, %2 : vector<16x128xf32>
    %4 = arith.mulf %3, %3 : vector<16x128xf32>
    %cst_3 = arith.constant dense<0.000000e+00> : vector<16x128xf32>
    %5 = tpu.matmul %4, %1, %cst_3 {dimension_numbers = #tpu.dot_dimension_numbers<[1], [0], [0], [1], [0, 0, 1, 1], [], []>} : vector<16x128xf32>, vector<128x128xf32>, vector<16x128xf32> -> vector<16x128xf32>
    %cst_4 = arith.constant 9.99999997E-7 : f32
    %6 = vector.broadcast %cst_4 : f32 to vector<16x128xf32>
    %7 = arith.addf %5, %6 : vector<16x128xf32>
    %8 = math.rsqrt %7 : vector<16x128xf32>
    %9 = arith.mulf %3, %8 : vector<16x128xf32>
    %10 = arith.truncf %9 : vector<16x128xf32> to vector<16x128xbf16>
    %c0_5 = arith.constant 0 : index
    %c0_6 = arith.constant 0 : index
    %11 = vector.load %arg3[%c0_5, %c0_6] : memref<128x128xbf16, #tpu.memory_space<vmem>>, vector<128x128xbf16>
    %cst_7 = arith.constant dense<0.000000e+00> : vector<16x128xf32>
    %12 = tpu.matmul %10, %11, %cst_7 {dimension_numbers = #tpu.dot_dimension_numbers<[1], [0], [0], [1], [0, 0, 1, 1], [], []>} : vector<16x128xbf16>, vector<128x128xbf16>, vector<16x128xf32> -> vector<16x128xf32>
    %c0_8 = arith.constant 0 : index
    %c0_9 = arith.constant 0 : index
    %13 = vector.load %arg4[%c0_8, %c0_9] : memref<1x128xf32, #tpu.memory_space<vmem>>, vector<1x128xf32>
    %14 = vector.broadcast %13 : vector<1x128xf32> to vector<16x128xf32>
    %15 = arith.addf %12, %14 : vector<16x128xf32>
    %cst_10 = arith.constant 0.000000e+00 : f32
    %16 = vector.broadcast %cst_10 : f32 to vector<16x128xf32>
    %17 = arith.maximumf %15, %16 : vector<16x128xf32>
    %18 = arith.truncf %17 : vector<16x128xf32> to vector<16x128xbf16>
    %c0_11 = arith.constant 0 : index
    %c0_12 = arith.constant 0 : index
    %19 = vector.load %arg5[%c0_11, %c0_12] : memref<128x128xbf16, #tpu.memory_space<vmem>>, vector<128x128xbf16>
    %cst_13 = arith.constant dense<0.000000e+00> : vector<16x128xf32>
    %20 = tpu.matmul %18, %19, %cst_13 {dimension_numbers = #tpu.dot_dimension_numbers<[1], [0], [0], [1], [0, 0, 1, 1], [], []>} : vector<16x128xbf16>, vector<128x128xbf16>, vector<16x128xf32> -> vector<16x128xf32>
    %c0_14 = arith.constant 0 : index
    %c0_15 = arith.constant 0 : index
    %21 = vector.load %arg6[%c0_14, %c0_15] : memref<1x128xf32, #tpu.memory_space<vmem>>, vector<1x128xf32>
    %22 = vector.broadcast %21 : vector<1x128xf32> to vector<16x128xf32>
    %23 = arith.addf %20, %22 : vector<16x128xf32>
    %c0_16 = arith.constant 0 : index
    %c0_17 = arith.constant 0 : index
    %24 = vector.load %arg7[%c0_16, %c0_17] : memref<16x128xf32, #tpu.memory_space<vmem>>, vector<16x128xf32>
    tpu.vector_store %arg7[%c0_16, %c0_17], %23 {strides = array<i32>} : memref<16x128xf32, #tpu.memory_space<vmem>>, vector<16x128xf32>,
    return
  }
  func.func @transform_0(%arg0: i32) -> (i32, i32) {
    %c0_i32 = arith.constant 0 : i32
    %c0_i32_0 = arith.constant 0 : i32
    return %arg0, %c0_i32 : i32, i32
  }
  func.func @transform_1(%arg0: i32) -> (i32, i32) {
    %c0_i32 = arith.constant 0 : i32
    %c0_i32_0 = arith.constant 0 : i32
    %c0_i32_1 = arith.constant 0 : i32
    return %c0_i32, %c0_i32_0 : i32, i32
  }
  func.func @transform_2(%arg0: i32) -> (i32, i32) {
    %c0_i32 = arith.constant 0 : i32
    %c0_i32_0 = arith.constant 0 : i32
    %c0_i32_1 = arith.constant 0 : i32
    return %c0_i32, %c0_i32_0 : i32, i32
  }
  func.func @transform_3(%arg0: i32) -> (i32, i32) {
    %c0_i32 = arith.constant 0 : i32
    %c0_i32_0 = arith.constant 0 : i32
    %c0_i32_1 = arith.constant 0 : i32
    return %c0_i32, %c0_i32_0 : i32, i32
  }
  func.func @transform_4(%arg0: i32) -> (i32, i32) {
    %c0_i32 = arith.constant 0 : i32
    %c0_i32_0 = arith.constant 0 : i32
    %c0_i32_1 = arith.constant 0 : i32
    return %c0_i32, %c0_i32_0 : i32, i32
  }
  func.func @transform_5(%arg0: i32) -> (i32, i32) {
    %c0_i32 = arith.constant 0 : i32
    %c0_i32_0 = arith.constant 0 : i32
    %c0_i32_1 = arith.constant 0 : i32
    return %c0_i32, %c0_i32_0 : i32, i32
  }
  func.func @transform_6(%arg0: i32) -> (i32, i32) {
    %c0_i32 = arith.constant 0 : i32
    %c0_i32_0 = arith.constant 0 : i32
    return %arg0, %c0_i32 : i32, i32
  }
}

</mosaic_0001>

<bundles_post_ra>
// kernel: tpu_custom_call.1
= control target key start
LH: loop header
LB: loop body
LE: loop exit
PB: predicated region body
PF: predicated region fallthrough
CT: control target
= control target key end

     0   :  { %11 = vsyncpa [#allocation3], 0  ;;  %s1618_s0 = inlined_call_operand.hbm [shape: f32[32,128], index: 0, kind: input, shape index: {}]   ;;  %s1619_s1 = inlined_call_operand.hbm [shape: f32[128,128], index: 1, kind: input, shape index: {}]   ;;  %s1620_s2 = inlined_call_operand.hbm [shape: bf16[128,128], index: 2, kind: input, shape index: {}]   ;;  %s1621_s3 = inlined_call_operand.vmem [shape: f32[1,128], index: 3, kind: input, shape index: {}]   ;;  %s1622_s4 = inlined_call_operand.hbm [shape: bf16[128,128], index: 4, kind: input, shape index: {}]   ;;  %s1623_s5 = inlined_call_operand.vmem [shape: f32[1,128], index: 5, kind: input, shape index: {}]   ;;  %s1624_s6 = inlined_call_operand.hbm [shape: f32[32,128], index: 6, kind: output, shape index: {}]  }
   0x1   :  { %13 = vsyncpa [#allocation3 + $0x1], 0 }
   0x2   :  { %14 = vsyncpa [#allocation6], 0 }
   0x3   :  { %15 = vsyncpa [#allocation9], 0 }
   0x4   :  { %16 = vsyncpa [#allocation4], 0 }
   0x5   :  { %18 = vsyncpa [#allocation4 + $0x1], 0  ;;  %s1376_s21 = smov 0   ;;  %s1378_s22 = smov 0  }
   0x6   :  { %s1380_s23 = smov 0   ;;  %s1382_s24 = smov 0  }
   0x7 LB: > { %s1397_s25 = sadd.s32 4294967295, %s1326_s24   ;;  %s839_s26 = sadd.s32 4294967294, %s1326_s24   ;;  %s1326_s24 = sphi %s1382_s24, %s1651_s24   ;;  %s1322_s23 = sphi %s1380_s23, %s1650_s23   ;;  %s1318_s22 = sphi %s1378_s22, %s1649_s22   ;;  %s1314_s21 = sphi %s1376_s21, %s1648_s21  }
   0x8   : > { %p44_p0 = scmp.ne.s32.totalorder %s1318_s22, %s1314_s21  ;;  %p1625_p1 = scmp.eq.s32.totalorder %s1397_s25, 0 }
   0x9   : > { %p173_p2 = scmp.eq.s32.totalorder %s1397_s25, 1  ;;  %p179_p3 = scmp.eq.s32.totalorder %s839_s26, 1 }
   0xa   : > { %p1406_p4 = por %p1625_p1, %p44_p0  ;;  %p840_p5 = scmp.ge.s32.totalorder %s1326_s24, 1 }
   0xb   : > { %p1411_p6 = por %p179_p3, %p44_p0  ;;  %p186_p7 = scmp.lt.s32.totalorder %s1326_s24, 3 }
   0xc   : > { %s1631_s27 = scalar_select %p1406_p4, 1, 0 }
   0xd   : > { %s1632_s28 = scalar_select %p1411_p6, 1, 0 }
   0xe   : > { %p1416_p8 = pnand %p840_p5, %p186_p7  ;;  %s1328_s30 = smov [#allocation5]  }
   0xf   : > { %s198_s7 = sshll.u32 %s1328_s30, 4  ;;  %s1329_s9 = smov [#allocation7]   ;;  %s199_s7 = int_to_ptr.vmem [resolvable:$true] %s198_s7 }
  0x10   : > { %s1633_s29 = scalar_select %p1416_p8, 1, 0 }
  0x11   : > { %p1059_p9 = pneg %p1416_p8  ;;  %s211_s10 = sshll.u32 %s1329_s9, 4  ;;  %s212_s10 = int_to_ptr.vmem [resolvable:$true] %s211_s10 }
  0x12   : > { %s1159_s11 = scalar_lea.vmem %s199_s7, 2048  ;;  %p1167_p5 = scmp.lt.s32.totalorder %s199_s7, %s199_s7 }
  0x13   : > { %p1425_p11 = pnand %p1059_p9, %p1625_p1  ;;  %p1160_p13 = scmp.ne.s32.totalorder %s199_s7, %s1159_s11 }
  0x14   : > { %p1168_p7 = scmp.lt.s32.totalorder %s1159_s11, %s1159_s11 }
  0x15   : > { %p1150_p12 = pneg %p1425_p11 }
  0x16   : > { %p1169_p10 = por %p1168_p7, %p1167_p5 }
  0x17   : > { %p1162_p0 = pnand %p1160_p13, %p1150_p12 }
  0x19   : > { %p1163_p3 = pneg %p1162_p0 }
  0x1b   : > { %p1170_p9 = pnand %p1169_p10, %p1163_p3 }
  0x1d   : > { %1173 = shalt.err (!%p1170_p9)
}
  0x1e   : > { %s1626_s12 = smov 128   ;;  %s1627_s13 = smov 8  }
  0x1f   : > { %1062 = dma.hbm_to_vmem [thread:$0]  (!%p1425_p11), %s1619_s1, 2048, %s199_s7, [#allocation6], %s1626_s12, %s1626_s12, %s1627_s13  }
  0x20   : > { %s1185_s16 = scalar_lea.vmem %s212_s10, 1024  ;;  %p1193_p10 = scmp.lt.s32.totalorder %s212_s10, %s212_s10 }
  0x21   : > { %p1186_p13 = scmp.ne.s32.totalorder %s212_s10, %s1185_s16  ;;  %p1194_p3 = scmp.lt.s32.totalorder %s1185_s16, %s1185_s16 }
  0x23   : > { %p1188_p0 = pnand %p1186_p13, %p1150_p12  ;;  %p1195_p7 = por %p1194_p3, %p1193_p10 }
  0x25   : > { %p1189_p5 = pneg %p1188_p0 }
  0x27   : > { %p1196_p9 = pnand %p1195_p7, %p1189_p5 }
  0x29   : > { %1199 = shalt.err (!%p1196_p9)
}
  0x2a   : > { %s1332_s17 = smov 64   ;;  %s1333_s18 = smov 4  }
  0x2b   : > { %1065 = dma.hbm_to_vmem [thread:$0]  (!%p1425_p11), %s1620_s2, 1024, %s212_s10, [#allocation6], %s1332_s17, %s1332_s17, %s1333_s18  }
  0x2c   : > { %s1334_s26 = smov [#allocation8]   ;;  %s1451_s7 = sadd.s32 1, %s1326_s24  }
  0x2d   : > { %s227_s30 = sshll.u32 %s1334_s26, 4  ;;  %s228_s30 = int_to_ptr.vmem [resolvable:$true] %s227_s30 }
  0x2e   : > { %s1211_s9 = scalar_lea.vmem %s228_s30, 1024  ;;  %p1219_p10 = scmp.lt.s32.totalorder %s228_s30, %s228_s30 }
  0x2f   : > { %p1212_p13 = scmp.ne.s32.totalorder %s228_s30, %s1211_s9  ;;  %p1220_p3 = scmp.lt.s32.totalorder %s1211_s9, %s1211_s9 }
  0x31   : > { %p1214_p0 = pnand %p1212_p13, %p1150_p12  ;;  %p1221_p7 = por %p1220_p3, %p1219_p10 }
  0x33   : > { %p1215_p5 = pneg %p1214_p0 }
  0x35   : > { %p1222_p9 = pnand %p1221_p7, %p1215_p5 }
  0x37   : > { %1225 = shalt.err (!%p1222_p9)
}
  0x38   : > { %1068 = dma.hbm_to_vmem [thread:$0]  (!%p1425_p11), %s1622_s4, 1024, %s228_s30, [#allocation9], %s1332_s17, %s1332_s17, %s1333_s18  }
  0x39   : > { %s28_s14 = ssub.s32 %s1326_s24, %s1451_s7  ;;  %s31_s15 = sadd.s32 1, %s1322_s23 }
  0x3a   : > { %p29_p12 = scmp.eq.s32.totalorder %s28_s14, 0  ;;  %p38_p13 = scmp.ne.s32.totalorder %s1322_s23, %s1318_s22 }
  0x3b   : > { %p39_p0 = scmp.eq.s32.totalorder %s1326_s24, 0  ;;  %p1080_p5 = scmp.lt.s32.totalorder %s1326_s24, 2 }
  0x3c   : > { %s1469_s8 = scalar_select %p29_p12, %s1322_s23, %s31_s15  }
  0x3d   : > { %p40_p10 = por %p39_p0, %p38_p13  ;;  %p1473_p3 = por %p173_p2, %p38_p13 }
  0x3e   : > { %s244_s19 = sand.u32 1, %s1322_s23   ;;  %s877_s20 = sshll.u32 %s1326_s24, 8 }
  0x3f   : > { %s1635_s16 = scalar_select %p1473_p3, 1, 0 }
  0x40   : > { %s845_s26 = sshll.u32 %s244_s19, 4  ;;  %s1482_s17 = scalar_lea.hbm %s1618_s0, %s877_s20 }
  0x41   : > { %s248_s18 = scalar_lea.vmem [#allocation2], %s845_s26  ;;  %p1484_p11 = pnand %p1080_p5, %p40_p10 }
  0x42   : > { %s255_s30 = sshll.u32 %s248_s18, 4  ;;  %s1490_s14 = scalar_lea.sflag [#allocation3], %s244_s19  ;;  %s1488_s30 = int_to_ptr.vmem [resolvable:$true] %s255_s30 }
  0x43   : > { %s1226_s15 = scalar_lea.hbm %s1482_s17, 256  ;;  %p1228_p7 = pneg %p1484_p11 }
  0x44   : > { %p1227_p2 = scmp.ne.s32.totalorder %s1482_s17, %s1226_s15  ;;  %s1231_s26 = scalar_lea.hbm %s1618_s0, 512 }
  0x45   : > { %p1232_p13 = scmp.lt.s32.totalorder %s1482_s17, %s1618_s0  ;;  %p1233_p0 = scmp.lt.s32.totalorder %s1231_s26, %s1226_s15 }
  0x46   : > { %p1229_p9 = pnand %p1228_p7, %p1227_p2 }
  0x47   : > { %p1234_p5 = por %p1233_p0, %p1232_p13 }
  0x48   : > { %p1230_p12 = pneg %p1229_p9 }
  0x4a   : > { %p1235_p10 = pnand %p1234_p5, %p1230_p12 }
  0x4c   : > { %1238 = shalt.err (!%p1235_p10)
}
  0x4d   : > { %s1239_s19 = scalar_lea.vmem %s1488_s30, 256  ;;  %s1335_s12 = smov [#allocation2]  }
  0x4e   : > { %p1240_p1 = scmp.ne.s32.totalorder %s1488_s30, %s1239_s19  ;;  %s1244_s13 = sshll.u32 %s1335_s12, 4  ;;  %s1245_s13 = int_to_ptr.vmem [resolvable:$false] %s1244_s13 }
  0x4f   : > { %s1246_s20 = scalar_lea.vmem %s1245_s13, 512  ;;  %p1247_p9 = scmp.lt.s32.totalorder %s1488_s30, %s1245_s13 }
  0x50   : > { %p1242_p6 = pnand %p1240_p1, %p1228_p7  ;;  %p1248_p3 = scmp.lt.s32.totalorder %s1246_s20, %s1239_s19 }
  0x52   : > { %p1243_p2 = pneg %p1242_p6  ;;  %p1249_p4 = por %p1248_p3, %p1247_p9 }
  0x54   : > { %p1250_p8 = pnand %p1249_p4, %p1243_p2 }
  0x56   : > { %1253 = shalt.err (!%p1250_p8)
}
  0x57   : > { %s1637_s15 = smov 8   ;;  %s1638_s9 = smov 128  }
  0x58   : > { %1072 = dma.hbm_to_vmem [thread:$0]  (!%p1484_p11), %s1482_s17, 256, %s1488_s30, %s1490_s14, %s1638_s9, %s1638_s9, %s1637_s15  }
  0x59   : > { %p1639_p1 = scmp.ne.s32.totalorder %s1633_s29, 0 }
  0x5a   : > { %s1517_s12 = sand.u32 (!%p1639_p1), 1, %s1318_s22   ;;  %p1640_p4 = scmp.ne.s32.totalorder (!%p1639_p1), %s1631_s27, 0 }
  0x5b   : > { %267 = sbr.rel (%p1639_p1) target bundleno = 967 (0x3c7), region = 44  ;;  %s849_s13 = sshll.u32 (!%p1639_p1), %s1517_s12, 4 }
  0x5c   : > { %s270_s26 = scalar_lea.sflag (!%p1639_p1), [#allocation3], %s1517_s12  ;;  %s1523_s10 = scalar_lea.vmem (!%p1639_p1), [#allocation2], %s849_s13 }
  0x60   : > { %1297 = dma.done.wait (%p1640_p4), %s270_s26, 256  }
  0x61   : > { %1299 = vsyncadd (%p1640_p4), %s270_s26, 4294967040  ;;  %p1641_p6 = scmp.eq.s32.totalorder %s1397_s25, 0 }
  0x63   : > { %1301 = dma.done.wait (%p1641_p6), [#allocation6], 3072   ;;  %p1642_p8 = pmov %p1641_p6 }
  0x64   : > { %p1643_p3 = pmov %p1641_p6 }
  0x65   : > { %1303 = vsyncadd (%p1642_p8), [#allocation6], 4294964224 }
  0x66   : > { %1305 = dma.done.wait (%p1643_p3), [#allocation9], 1024   ;;  %p1644_p11 = pmov %p1643_p3 }
  0x67   : > { %v334_v0 = vld [vmem:[#allocation5 + $0x78] sm:$0xff]  ;;  %v333_v1 = vld [vmem:[#allocation5 + $0x70] sm:$0xff]  ;;  %v332_v2 = vld [vmem:[#allocation5 + $0x68] sm:$0xff]  ;;  %v1336_v19 = vmov 0.0   ;;  %vm1337_vm0 = vmmov 0   ;;  %s313_s14 = scalar_lea.vmem [#allocation10], %s849_s13 }
  0x68   : > { %1307 = vsyncadd (%p1644_p11), [#allocation9], 4294966272  ;;  %933 = vmatprep.subr.mxu0 %v334_v0  ;;  %968 = vmatprep.subr.mxu1 %v334_v0  ;;  %v331_v3 = vld [vmem:[#allocation5 + $0x60] sm:$0xff]  ;;  %v330_v4 = vld [vmem:[#allocation5 + $0x58] sm:$0xff]  ;;  %s737_s11 = sshll.u32 %s313_s14, 4  ;;  %s878_s18 = sshll.u32 %s1397_s25, 8  ;;  %s1570_s11 = int_to_ptr.vmem [resolvable:$true] %s737_s11 }
  0x69   : > { %934 = vmatpush3.msra.mxu0 %v334_v0  ;;  %969 = vmatpush3.msra.mxu1 %v334_v0  ;;  %v1538_v5 = vld [vmem:[%s1523_s10] sm:$0xff]  ;;  %v328_v7 = vld [vmem:[#allocation5 + $0x48] sm:$0xff]  ;;  %v326_v9 = vld [vmem:[#allocation5 + $0x38] sm:$0xff]  ;;  %s1575_s15 = scalar_lea.hbm %s1624_s6, %s878_s18  ;;  %s724_s9 = scalar_lea.sflag [#allocation4], %s1517_s12 }
  0x6a   : > { %935 = vmatprep.subr.mxu0 %v333_v1  ;;  %970 = vmatprep.subr.mxu1 %v333_v1  ;;  %v329_v6 = vld [vmem:[#allocation5 + $0x50] sm:$0xff]  ;;  %v327_v8 = vld [vmem:[#allocation5 + $0x40] sm:$0xff]  ;;  %v324_v11 = vld [vmem:[#allocation5 + $0x28] sm:$0xff]  ;;  %s1254_s13 = scalar_lea.vmem %s1570_s11, 256  ;;  %p1645_p12 = scmp.ne.s32.totalorder %s1635_s16, 0 }
  0x6b   : > { %936 = vmatpush3.msra.mxu0 %v333_v1  ;;  %971 = vmatpush3.msra.mxu1 %v333_v1  ;;  %v325_v10 = vld [vmem:[#allocation5 + $0x30] sm:$0xff]  ;;  %v323_v12 = vld [vmem:[#allocation5 + $0x20] sm:$0xff]  ;;  %v322_v13 = vld [vmem:[#allocation5 + $0x18] sm:$0xff]  ;;  %p1255_p7 = scmp.ne.s32.totalorder %s1570_s11, %s1254_s13  ;;  %s1338_s25 = smov [#allocation10]  }
  0x6c   : > { %937 = vmatprep.subr.mxu0 %v332_v2  ;;  %972 = vmatprep.subr.mxu1 %v332_v2  ;;  %v321_v14 = vld [vmem:[#allocation5 + $0x10] sm:$0xff]  ;;  %v320_v15 = vld [vmem:[#allocation5 + $0x8] sm:$0xff]  ;;  %v319_v16 = vld [vmem:[#allocation5] sm:$0xff]  ;;  %s1258_s26 = sshll.u32 %s1338_s25, 4  ;;  %s1259_s26 = int_to_ptr.vmem [resolvable:$false] %s1258_s26 }
  0x6d   : > { %938 = vmatpush3.msra.mxu0 %v332_v2  ;;  %965 = vmatprep.mubr.f32.mxu0 %v1538_v5  ;;  %v318_v17 = vld [vmem:[%s1523_s10 + $0x8] sm:$0xff]  ;;  %v1129_v20 = vld [vmem:[#allocation7 + $0x30] sm:$0xff]   ;;  %v1131_v28 = vld [vmem:[#allocation7 + $0x20] sm:$0xff]   ;;  %p1256_p13 = pnand %p1255_p7, %p1645_p12  ;;  %s1260_s10 = scalar_lea.vmem %s1259_s26, 512 }
  0x6e   : > { %939 = vmatprep.subr.mxu0 %v331_v3  ;;  %973 = vmatpush3.msra.mxu1 %v332_v2  ;;  %v1128_v18 = vld [vmem:[#allocation7 + $0x38] sm:$0xff]   ;;  %v1130_v27 = vld [vmem:[#allocation7 + $0x28] sm:$0xff]   ;;  %v1133_v30 = vld [vmem:[#allocation7 + $0x10] sm:$0xff]   ;;  %p1261_p5 = scmp.lt.s32.totalorder %s1570_s11, %s1259_s26  ;;  %p1262_p10 = scmp.lt.s32.totalorder %s1260_s10, %s1254_s13 }
  0x6f   : > { %940 = vmatpush3.msra.mxu0 %v331_v3  ;;  %974 = vmatprep.subr.mxu1 %v331_v3  ;;  %v1132_v29 = vld [vmem:[#allocation7 + $0x18] sm:$0xff]   ;;  %v1134_v31 = vld [vmem:[#allocation7 + $0x8] sm:$0xff]   ;;  %v1135_v32 = vld [vmem:[#allocation7] sm:$0xff]   ;;  %p1257_p0 = pneg %p1256_p13 }
  0x70   : > { %941 = vmatprep.subr.mxu0 %v330_v4  ;;  %975 = vmatpush3.msra.mxu1 %v331_v3  ;;  %v1136_v33 = vld [vmem:[#allocation8 + $0x38] sm:$0xff]   ;;  %v1137_v34 = vld [vmem:[#allocation8 + $0x30] sm:$0xff]   ;;  %v1138_v35 = vld [vmem:[#allocation8 + $0x28] sm:$0xff]   ;;  %p1263_p2 = por %p1262_p10, %p1261_p5 }
  0x71   : > { %942 = vmatpush3.msra.mxu0 %v330_v4  ;;  %976 = vmatprep.subr.mxu1 %v330_v4  ;;  %v1139_v36 = vld [vmem:[#allocation8 + $0x20] sm:$0xff]   ;;  %v1140_v37 = vld [vmem:[#allocation8 + $0x18] sm:$0xff]   ;;  %v1141_v47 = vld [vmem:[#allocation8 + $0x10] sm:$0xff]  }
  0x72   : > { %943 = vmatprep.subr.mxu0 %v329_v6  ;;  %977 = vmatpush3.msra.mxu1 %v330_v4  ;;  %v1142_v48 = vld [vmem:[#allocation8 + $0x8] sm:$0xff]   ;;  %v1143_v49 = vld [vmem:[#allocation8] sm:$0xff]   ;;  %p1264_p9 = pnand %p1263_p2, %p1257_p0 }
  0x73   : > { %944 = vmatpush3.msra.mxu0 %v329_v6  ;;  %978 = vmatprep.subr.mxu1 %v329_v6  ;;  %v854_v50 = vld [vmem:[%s1621_s3] ss:$0 sm:$0xff] }
  0x74   : > { %945 = vmatprep.subr.mxu0 %v328_v7  ;;  %979 = vmatpush3.msra.mxu1 %v329_v6  ;;  %v863_v60 = vld [vmem:[%s1623_s5] ss:$0 sm:$0xff] }
  0x75   : > { %946 = vmatpush3.msra.mxu0 %v328_v7  ;;  %980 = vmatprep.subr.mxu1 %v328_v7 }
  0x76   : > { %947 = vmatprep.subr.mxu0 %v327_v8  ;;  %981 = vmatpush3.msra.mxu1 %v328_v7 }
  0x77   : > { %948 = vmatpush3.msra.mxu0 %v327_v8  ;;  %982 = vmatprep.subr.mxu1 %v327_v8 }
  0x78   : > { %949 = vmatprep.subr.mxu0 %v326_v9  ;;  %983 = vmatpush3.msra.mxu1 %v327_v8 }
  0x79   : > { %950 = vmatpush3.msra.mxu0 %v326_v9  ;;  %984 = vmatprep.subr.mxu1 %v326_v9 }
  0x7a   : > { %951 = vmatprep.subr.mxu0 %v325_v10  ;;  %985 = vmatpush3.msra.mxu1 %v326_v9 }
  0x7b   : > { %952 = vmatpush3.msra.mxu0 %v325_v10  ;;  %986 = vmatprep.subr.mxu1 %v325_v10 }
  0x7c   : > { %953 = vmatprep.subr.mxu0 %v324_v11  ;;  %987 = vmatpush3.msra.mxu1 %v325_v10 }
  0x7d   : > { %954 = vmatpush3.msra.mxu0 %v324_v11  ;;  %988 = vmatprep.subr.mxu1 %v324_v11 }
  0x7e   : > { %955 = vmatprep.subr.mxu0 %v323_v12  ;;  %989 = vmatpush3.msra.mxu1 %v324_v11 }
  0x7f   : > { %956 = vmatpush3.msra.mxu0 %v323_v12  ;;  %990 = vmatprep.subr.mxu1 %v323_v12 }
  0x80   : > { %957 = vmatprep.subr.mxu0 %v322_v13  ;;  %991 = vmatpush3.msra.mxu1 %v323_v12 }
  0x81   : > { %958 = vmatpush3.msra.mxu0 %v322_v13  ;;  %992 = vmatprep.subr.mxu1 %v322_v13 }
  0x82   : > { %959 = vmatprep.subr.mxu0 %v321_v14  ;;  %993 = vmatpush3.msra.mxu1 %v322_v13 }
  0x83   : > { %960 = vmatpush3.msra.mxu0 %v321_v14  ;;  %994 = vmatprep.subr.mxu1 %v321_v14 }
  0x84   : > { %961 = vmatprep.subr.mxu0 %v320_v15  ;;  %995 = vmatpush3.msra.mxu1 %v321_v14 }
  0x85   : > { %962 = vmatpush3.msra.mxu0 %v320_v15  ;;  %996 = vmatprep.subr.mxu1 %v320_v15 }
  0x86   : > { %963 = vmatprep.subr.mxu0 %v319_v16  ;;  %997 = vmatpush3.msra.mxu1 %v320_v15 }
  0x87   : > { %964 = vmatpush3.msra.mxu0 %v319_v16  ;;  %998 = vmatprep.subr.mxu1 %v319_v16 }
  0x88   : > { %966 = vmatmul.mubr.f32.vlgmr.msra.gmra.mxu0 %v318_v17  ;;  %999 = vmatpush3.msra.mxu1 %v319_v16 }
  0x89   : > { %1003 = vmatprep.subr.bf16.mxu0 %v1336_v19  ;;  %1023 = vmatprep.subr.bf16.mxu1 %v1336_v19 }
  0x8a   : > { %1004 = vmatpush3.bf16.msra.mxu0 %v1128_v18  ;;  %1019 = vmatprep.mubr.msk.bf16.mxu0 %vm1337_vm0, %v1336_v19 }
  0x8b   : > { %1005 = vmatprep.subr.bf16.mxu0 %v1336_v19 }
  0x8e   : > { %1006 = vmatpush3.bf16.msra.mxu0 %v1129_v20 }
  0x8f   : > { %1007 = vmatprep.subr.bf16.mxu0 %v1336_v19 }
  0x92   : > { %1008 = vmatpush3.bf16.msra.mxu0 %v1130_v27 }
  0x93   : > { %1009 = vmatprep.subr.bf16.mxu0 %v1336_v19 }
  0x96   : > { %1010 = vmatpush3.bf16.msra.mxu0 %v1131_v28 }
  0x97   : > { %1011 = vmatprep.subr.bf16.mxu0 %v1336_v19 }
  0x9a   : > { %1012 = vmatpush3.bf16.msra.mxu0 %v1132_v29 }
  0x9b   : > { %1013 = vmatprep.subr.bf16.mxu0 %v1336_v19 }
  0x9e   : > { %1014 = vmatpush3.bf16.msra.mxu0 %v1133_v30 }
  0x9f   : > { %1015 = vmatprep.subr.bf16.mxu0 %v1336_v19 }
  0xa2   : > { %1016 = vmatpush3.bf16.msra.mxu0 %v1134_v31 }
  0xa3   : > { %1017 = vmatprep.subr.bf16.mxu0 %v1336_v19 }
  0xa6   : > { %1018 = vmatpush3.bf16.msra.mxu0 %v1135_v32 }
 0x148   : > { %v967_v21 = vpop.f32.mrf.mxu0 }
 0x149   : > { %v411_v22 = vsub.f32 %v318_v17, %v967_v21 }
 0x14a   : > { %v401_v23 = vpop.f32.mrf.mxu0 }
 0x14b   : > { %v410_v24 = vsub.f32 %v1538_v5, %v401_v23  ;;  %v413_v26 = vmul.f32 %v411_v22, %v411_v22 }
 0x14d   : > { %v412_v25 = vmul.f32 %v410_v24, %v410_v24 }
 0x14f   : > { %1000 = vmatprep.mubr.f32.mxu1 %v412_v25 }
 0x150   : > { %1001 = vmatmul.mubr.f32.vlgmr.msra.gmra.mxu1 %v413_v26 }
 0x151   : > { %1039 = vmatprep.mubr.msk.bf16.mxu1 %vm1337_vm0, %v1336_v19  ;;  %1024 = vmatpush3.bf16.msra.mxu1 %v1136_v33 }
 0x152   : > { %1025 = vmatprep.subr.bf16.mxu1 %v1336_v19 }
 0x155   : > { %1026 = vmatpush3.bf16.msra.mxu1 %v1137_v34 }
 0x156   : > { %1027 = vmatprep.subr.bf16.mxu1 %v1336_v19 }
 0x159   : > { %1028 = vmatpush3.bf16.msra.mxu1 %v1138_v35 }
 0x15a   : > { %1029 = vmatprep.subr.bf16.mxu1 %v1336_v19 }
 0x15d   : > { %1030 = vmatpush3.bf16.msra.mxu1 %v1139_v36 }
 0x15e   : > { %1031 = vmatprep.subr.bf16.mxu1 %v1336_v19 }
 0x161   : > { %1032 = vmatpush3.bf16.msra.mxu1 %v1140_v37 }
 0x162   : > { %1033 = vmatprep.subr.bf16.mxu1 %v1336_v19 }
 0x165   : > { %1034 = vmatpush3.bf16.msra.mxu1 %v1141_v47 }
 0x166   : > { %1035 = vmatprep.subr.bf16.mxu1 %v1336_v19 }
 0x169   : > { %1036 = vmatpush3.bf16.msra.mxu1 %v1142_v48 }
 0x16a   : > { %1037 = vmatprep.subr.bf16.mxu1 %v1336_v19 }
 0x16d   : > { %1038 = vmatpush3.bf16.msra.mxu1 %v1143_v49 }
 0x210   : > { %v1002_v38 = vpop.f32.mrf.mxu1 }
 0x211   : > { %v486_v39 = vadd.f32 1e-06, %v1002_v38 }
 0x212   : > { %v480_v40 = vpop.f32.mrf.mxu1 }
 0x213   : > { %1144 = vrsqrt.f32 %v486_v39  ;;  %v481_v41 = vadd.f32 1e-06, %v480_v40 }
 0x215   : > { %1146 = vrsqrt.f32 %v481_v41 }
 0x220   : > { %v1145_v42 = vpop.eup %1144 }
 0x221   : > { %v492_v45 = vmul.f32 %v1145_v42, %v411_v22 }
 0x222   : > { %v1147_v43 = vpop.eup %1146 }
 0x223   : > { %v491_v44 = vmul.f32 %v1147_v43, %v410_v24 }
 0x225   : > { %v493_v46 = vpack.c.bf16 %v492_v45, %v491_v44 }
 0x227   : > { %1020 = vmatmul.mubr.bf16.vlgmr.msra.gmra.mxu0 %v493_v46 }
 0x2e7   : > { %v599_v51 = vpop.f32.mrf.mxu0 }
 0x2e8   : > { %v600_v53 = vadd.f32 %v854_v50, %v599_v51 }
 0x2e9   : > { %v1021_v52 = vpop.f32.mrf.mxu0 }
 0x2ea   : > { %v606_v57 = vmax.f32 %v600_v53, 0.0 }
 0x2eb   : > { %v602_v54 = vpop.f32.mrf.mxu0 }
 0x2ec   : > { %v603_v55 = vadd.f32 %v854_v50, %v602_v54 }
 0x2ed   : > { %v1022_v56 = vpop.f32.mrf.mxu0 }
 0x2ee   : > { %v607_v58 = vmax.f32 %v603_v55, 0.0 }
 0x2f0   : > { %v608_v59 = vpack.c.bf16 %v607_v58, %v606_v57 }
 0x2f2   : > { %1040 = vmatmul.mubr.bf16.vlgmr.msra.gmra.mxu1 %v608_v59 }
 0x3b2   : > { %v714_v61 = vpop.f32.mrf.mxu1 }
 0x3b3   : > { %v715_v62 = vadd.f32 %v863_v60, %v714_v61 }
 0x3b4   : > { %v1041_v63 = vpop.f32.mrf.mxu1 }
 0x3b5   : > { %721 = vst [vmem:[%s313_s14] sm:$0xff] %v715_v62 }
 0x3b6   : > { %v717_v0 = vpop.f32.mrf.mxu1 }
 0x3b7   : > { %v718_v1 = vadd.f32 %v863_v60, %v717_v0 }
 0x3b8   : > { %v1042_v2 = vpop.f32.mrf.mxu1 }
 0x3b9   : > { %722 = vst [vmem:[%s313_s14 + $0x8] sm:$0xff] %v718_v1 }
 0x3ba   : > { %1267 = shalt.err (!%p1264_p9)
}
 0x3bb   : > { %s1268_s27 = scalar_lea.hbm %s1575_s15, 256  ;;  %s1272_s30 = scalar_lea.hbm %s1624_s6, 512 }
 0x3bc   : > { %p1269_p1 = scmp.ne.s32.totalorder %s1575_s15, %s1268_s27  ;;  %p1273_p8 = scmp.lt.s32.totalorder %s1575_s15, %s1624_s6 }
 0x3bd   : > { %p1274_p3 = scmp.lt.s32.totalorder %s1272_s30, %s1268_s27 }
 0x3be   : > { %p1270_p4 = pnand %p1269_p1, %p1645_p12 }
 0x3bf   : > { %p1275_p11 = por %p1274_p3, %p1273_p8 }
 0x3c0   : > { %p1271_p6 = pneg %p1270_p4 }
 0x3c2   : > { %p1276_p7 = pnand %p1275_p11, %p1271_p6 }
 0x3c4   : > { %1279 = shalt.err (!%p1276_p7)
}
 0x3c5   : > { %s1339_s19 = smov 128   ;;  %s1340_s20 = smov 8  }
 0x3c6   : > { %1057 = dma.vmem_to_hbm [thread:$0]  (%p1645_p12), %s1570_s11, 256, %s1575_s15, %s724_s9, %s1339_s19, %s1339_s19, %s1340_s20  }
 0x3c7 PF: > { %s752_s13 = sand.u32 1, %s1314_s21   ;;  %p1646_p13 = scmp.ne.s32.totalorder %s1632_s28, 0 }
 0x3c8   : > { %p1647_p0 = scmp.ge.s32.totalorder %s1326_s24, 2  ;;  %s753_s25 = scalar_lea.sflag [#allocation4], %s752_s13 }
 0x3ca   : > { %p1074_p5 = pnand %p1647_p0, %p1646_p13 }
 0x3cc   : > { %p1075_p10 = pneg %p1074_p5 }
 0x3ce   : > { %1309 = dma.done.wait (%p1075_p10), %s753_s25, 256  }
 0x3cf   : > { %1311 = vsyncadd (%p1075_p10), %s753_s25, 4294967040  ;;  %p21_p2 = scmp.ge.s32.totalorder %s1451_s7, 4   ;;  %s1648_s21 = smov %s1318_s22 }
 0x3d0   : > { %s1649_s22 = smov %s1322_s23  ;;  %s1650_s23 = smov %s1469_s8 }
 0x3d1   : > { %s1651_s24 = smov %s1451_s7  ;;  %23 = sbr.rel (!%p21_p2) target bundleno = 7 (0x7), region = 101 }
 0x3d6   :  { %758 = vsyncpa [#allocation3], 1 }
 0x3d7   :  { %760 = vsyncpa [#allocation3 + $0x1], 1 }
 0x3d8   :  { %761 = vsyncpa [#allocation6], 1 }
 0x3d9   :  { %762 = vsyncpa [#allocation9], 1 }
 0x3da   :  { %763 = vsyncpa [#allocation4], 1 }
 0x3db   :  { %765 = vsyncpa [#allocation4 + $0x1], 1 }

</bundles_post_ra>
